<compile_context>
chip_gen: v6e
topology: v6e:2x2x1
jax: 0.10.0
libtpu: 0.0.40
codegen_flags: <defaults>
</compile_context>

<pallas_src>
import jax
import jax.numpy as jnp
from jax.experimental import pallas as pl
from jax.experimental.pallas import tpu as pltpu

IN_FEATURES = 10
OUT_FEATURES = 5

# Rows per grid step. Big enough to amortize the ~0.35us per-step overhead; at 10/5-wide
# blocks this is only tens of KiB double-buffered, so VMEM never constrains the choice.
TARGET_TILE_B = 1024


def linear_kernel(x_ref, w_ref, b_ref, o_ref):
    # x_ref: (TB, 10)  w_ref: (10, 5)  b_ref: (1, 5)  o_ref: (TB, 5)
    # Narrow matmul + bias add; MXU/VPU slots have huge slack — DMA bytes are the
    # binding resource, so we keep everything at its logical width.
    x = x_ref[...]
    w = w_ref[...]
    b = b_ref[...]
    y = jnp.dot(x, w, preferred_element_type=jnp.float32) + b
    o_ref[...] = y.astype(o_ref.dtype)


def _round_up(n, m):
    return ((n + m - 1) // m) * m


def _pick_tile(b_pad, target):
    """Largest multiple of 8 that divides b_pad and is <= target (b_pad is a mult of 8)."""
    target = max(8, min(target, b_pad))
    target = (target // 8) * 8
    for d in range(target, 7, -8):
        if b_pad % d == 0:
            return d
    return 8


def dummy_model_forward(x, weight, bias):
    """Equivalent of torch nn.Linear(10, 5): y = x @ W^T + b.

    x:      (B, 10)  f32
    weight: (5, 10)  f32  (torch layout: out_features x in_features)
    bias:   (5,)     f32
    returns (B, 5)   f32
    """
    B = x.shape[0]
    B_pad = _round_up(B, 8)

    # Ensure >= 2 grid steps when there's enough work, so v7x's two TensorCores both
    # get a share of the batch (harmless extra step on single-TC v5e/v6e).
    target = TARGET_TILE_B
    if B_pad >= 16:
        target = min(target, B_pad // 2)
    TB = _pick_tile(B_pad, target)

    # Pad only the batch rows (10 lanes wide -> negligible extra HBM traffic).
    x_in = jnp.pad(x, ((0, B_pad - B), (0, 0))) if B_pad != B else x
    w_t = weight.T                       # (10, 5): kernel computes x @ W (== torch x @ W^T)
    b_row = bias.reshape(1, OUT_FEATURES)

    # Bytes the call actually DMAs (logical widths, padded batch).
    cost = pl.CostEstimate(
        flops=2 * B_pad * IN_FEATURES * OUT_FEATURES,
        transcendentals=0,
        bytes_accessed=4 * (B_pad * IN_FEATURES + IN_FEATURES * OUT_FEATURES
                            + OUT_FEATURES + B_pad * OUT_FEATURES),
    )

    y = pl.pallas_call(
        linear_kernel,
        out_shape=jax.ShapeDtypeStruct((B_pad, OUT_FEATURES), x.dtype),
        grid=(B_pad // TB,),
        in_specs=[
            pl.BlockSpec((TB, IN_FEATURES), lambda i: (i, 0)),            # x tiles stream in
            pl.BlockSpec((IN_FEATURES, OUT_FEATURES), lambda i: (0, 0)),  # weight resident
            pl.BlockSpec((1, OUT_FEATURES), lambda i: (0, 0)),            # bias resident
        ],
        out_specs=pl.BlockSpec((TB, OUT_FEATURES), lambda i: (i, 0)),
        compiler_params=pltpu.CompilerParams(
            dimension_semantics=("parallel",),  # batch axis shards across TCs on v7x
        ),
        cost_estimate=cost,
    )(x_in, w_t, b_row)

    return y[:B] if B_pad != B else y


if __name__ == "__main__":
    key = jax.random.PRNGKey(0)
    kx, kw, kb = jax.random.split(key, 3)

    B = 8  # small batch, consistent with the module's (.., 10) -> (.., 5) forward
    x = jax.random.normal(kx, (B, IN_FEATURES), dtype=jnp.float32)

    # Deterministic parameter init (torch default: uniform, bound = 1/sqrt(fan_in)).
    bound = 1.0 / (IN_FEATURES ** 0.5)
    weight = jax.random.uniform(
        kw, (OUT_FEATURES, IN_FEATURES), dtype=jnp.float32, minval=-bound, maxval=bound
    )  # torch layout (out, in)
    bias = jax.random.uniform(
        kb, (OUT_FEATURES,), dtype=jnp.float32, minval=-bound, maxval=bound
    )

    y = dummy_model_forward(x, weight, bias)
    y = jax.block_until_ready(y)

    # Correctness check against plain JAX reference (torch semantics: x @ W^T + b).
    y_ref = x @ weight.T + bias
    assert y.shape == (B, OUT_FEATURES)
    assert jnp.allclose(y, y_ref, atol=1e-5, rtol=1e-5)

    print("KERNEL_OK")
</pallas_src>

<mosaic_0001>
module attributes {stable_mosaic.version = 11 : i64} {
  func.func @linear_kernel(%arg0: i32, %arg1: memref<8x10xf32, #tpu.memory_space<vmem>>, %arg2: memref<10x5xf32, #tpu.memory_space<vmem>>, %arg3: memref<1x5xf32, #tpu.memory_space<vmem>>, %arg4: memref<8x5xf32, #tpu.memory_space<vmem>>) attributes {dimension_semantics = [#tpu.dimension_semantics<parallel>], iteration_bounds = array<i64: 1>, scalar_prefetch = 0 : i64, scratch_operands = 0 : i64, tpu.core_type = #tpu.core_type<tc>, window_params = [{transform_indices = @transform_0, window_bounds = array<i64: 8, 10>}, {pipeline_mode = #tpu.pipeline_mode<synchronous>, transform_indices = @transform_1, window_bounds = array<i64: 10, 5>}, {pipeline_mode = #tpu.pipeline_mode<synchronous>, transform_indices = @transform_2, window_bounds = array<i64: 1, 5>}, {transform_indices = @transform_3, window_bounds = array<i64: 8, 5>}]} {
    %c0 = arith.constant 0 : index
    %c0_0 = arith.constant 0 : index
    %0 = vector.load %arg1[%c0, %c0_0] : memref<8x10xf32, #tpu.memory_space<vmem>>, vector<8x10xf32>
    %c0_1 = arith.constant 0 : index
    %c0_2 = arith.constant 0 : index
    %1 = vector.load %arg2[%c0_1, %c0_2] : memref<10x5xf32, #tpu.memory_space<vmem>>, vector<10x5xf32>
    %c0_3 = arith.constant 0 : index
    %c0_4 = arith.constant 0 : index
    %2 = vector.load %arg3[%c0_3, %c0_4] : memref<1x5xf32, #tpu.memory_space<vmem>>, vector<1x5xf32>
    %cst = arith.constant dense<0.000000e+00> : vector<8x5xf32>
    %3 = tpu.matmul %0, %1, %cst {dimension_numbers = #tpu.dot_dimension_numbers<[1], [0], [0], [1], [0, 0, 1, 1], [], []>} : vector<8x10xf32>, vector<10x5xf32>, vector<8x5xf32> -> vector<8x5xf32>
    %4 = vector.broadcast %2 : vector<1x5xf32> to vector<8x5xf32>
    %5 = arith.addf %3, %4 : vector<8x5xf32>
    %c0_5 = arith.constant 0 : index
    %c0_6 = arith.constant 0 : index
    %6 = vector.load %arg4[%c0_5, %c0_6] : memref<8x5xf32, #tpu.memory_space<vmem>>, vector<8x5xf32>
    tpu.vector_store %arg4[%c0_5, %c0_6], %5 {strides = array<i32>} : memref<8x5xf32, #tpu.memory_space<vmem>>, vector<8x5xf32>,
    return
  }
  func.func @transform_0(%arg0: i32) -> (i32, i32) {
    %c0_i32 = arith.constant 0 : i32
    %c0_i32_0 = arith.constant 0 : i32
    return %arg0, %c0_i32 : i32, i32
  }
  func.func @transform_1(%arg0: i32) -> (i32, i32) {
    %c0_i32 = arith.constant 0 : i32
    %c0_i32_0 = arith.constant 0 : i32
    %c0_i32_1 = arith.constant 0 : i32
    return %c0_i32, %c0_i32_0 : i32, i32
  }
  func.func @transform_2(%arg0: i32) -> (i32, i32) {
    %c0_i32 = arith.constant 0 : i32
    %c0_i32_0 = arith.constant 0 : i32
    %c0_i32_1 = arith.constant 0 : i32
    return %c0_i32, %c0_i32_0 : i32, i32
  }
  func.func @transform_3(%arg0: i32) -> (i32, i32) {
    %c0_i32 = arith.constant 0 : i32
    %c0_i32_0 = arith.constant 0 : i32
    return %arg0, %c0_i32 : i32, i32
  }
}

</mosaic_0001>

<bundles_post_ra>
// kernel: tpu_custom_call.1
= control target key start
LH: loop header
LB: loop body
LE: loop exit
PB: predicated region body
PF: predicated region fallthrough
CT: control target
= control target key end

     0   :  { %vm29_vm0 = vcmask 1041408   ;;  %v157_v1 = vmov 0.0   ;;  %vm158_vm1 = vmmov 0   ;;  %s195_s0 = inlined_call_operand.vmem [shape: f32[8,10], index: 0, kind: input, shape index: {}]   ;;  %s196_s1 = inlined_call_operand.vmem [shape: f32[10,5], index: 1, kind: input, shape index: {}]   ;;  %s197_s2 = inlined_call_operand.vmem [shape: f32[1,5], index: 2, kind: input, shape index: {}]   ;;  %s198_s3 = inlined_call_operand.hbm [shape: f32[8,5], index: 3, kind: output, shape index: {}]  }
   0x1   :  { %v17_v0 = vld [vmem:[%s196_s1 + $0x8] sm:$0x3]  ;;  %125 = vmatprep.subr.mxu0 %v157_v1  ;;  %v16_v2 = vld [vmem:[%s196_s1] sm:$0xff]  ;;  %129 = vmatprep.mubr.msk.f32.mxu0 %vm158_vm1, %v157_v1 }
   0x2   :  { %8 = vsyncpa [#allocation3], 0  ;;  %126 = vmatpush3.msk.msra.mxu0 %vm29_vm0, %v17_v0  ;;  %v15_v3 = vld [vmem:[%s195_s0] sm:$0xff]  ;;  %vm25_vm2 = vcmask 80896   ;;  %s159_s20 = smov [#allocation2]   ;;  %vm103_vm3 = vcmask 39936  }
   0x3   :  { %127 = vmatprep.subr.mxu0 %v157_v1  ;;  %v119_v4 = vld [vmem:[%s197_s2] ss:$0 sm:$0xff]  ;;  %s111_s21 = sshll.u32 %s159_s20, 4  ;;  %s112_s21 = int_to_ptr.vmem [resolvable:$true] %s111_s21 }
   0x4   :  { %128 = vmatpush3.msra.mxu0 %v16_v2  ;;  %s135_s1 = scalar_lea.vmem %s112_s21, 128  ;;  %p140_p1 = scmp.lt.s32.totalorder %s112_s21, %s112_s21 }
   0x5   :  { %130 = vmatmul.mubr.msk.f32.vlgmr.msra.gmra.mxu0 %vm25_vm2, %v15_v3  ;;  %p136_p0 = scmp.ne.s32.totalorder %s112_s21, %s135_s1  ;;  %p141_p2 = scmp.lt.s32.totalorder %s135_s1, %s135_s1 }
   0x7   :  { %p142_p3 = por %p141_p2, %p140_p1 }
   0x9   :  { %p143_p4 = pnand %p142_p3, %p136_p0 }
  0xc5   :  { %v99_v5 = vpop.f32.mrf.mxu0 }
  0xc6   :  { %v100_v6 = vadd.f32 %v119_v4, %v99_v5 }
  0xc7   :  { %v131_v7 = vpop.f32.mrf.mxu0 }
  0xc8   :  { %104 = vst.msk [vmem:[#allocation2] sm:$0xff] %vm103_vm3, %v100_v6 }
  0xc9   :  { %146 = shalt.err (!%p143_p4)
}
  0xca   :  { %114 = dma.vmem_to_hbm [thread:$0]  %s112_s21, 128, %s198_s3, [#allocation3]  }
  0xcb   :  { %155 = dma.done.wait [#allocation3], 128  }
  0xcc   :  { %156 = vsyncadd [#allocation3], 4294967168 }
  0xcd   :  { %118 = vsyncpa [#allocation3], 1 }

</bundles_post_ra>
